<compile_context>
chip_gen: v5e
topology: v5e:2x2
jax: 0.10.0
libtpu: 0.0.40
codegen_flags: <defaults>
</compile_context>

<pallas_src>
import functools

import jax
import jax.numpy as jnp
from jax.experimental import pallas as pl
from jax.experimental.pallas import tpu as pltpu


def _round_up(x, m):
    return (x + m - 1) // m * m


def _round_down(x, m):
    return max(m, (x // m) * m)


def _resnet_block_kernel(*refs, has_shortcut, hidden_chunk):
    if has_shortcut:
        x_ref, w0_ref, b0_ref, w1_ref, b1_ref, ws_ref, out_ref = refs
    else:
        x_ref, w0_ref, b0_ref, w1_ref, b1_ref, out_ref = refs
        ws_ref = None

    size_h = w0_ref.shape[1]

    # x may arrive as bf16 (cheaper HBM read); relu / residual math in f32.
    x_f32 = x_ref[...].astype(jnp.float32)                 # [tm, size_in]
    a0 = jnp.maximum(x_f32, 0.0).astype(jnp.bfloat16)      # fc_0 LHS (bf16)

    # Residual / shortcut + fc_1 bias, accumulated in f32.
    if has_shortcut:
        acc = jnp.dot(x_ref[...].astype(jnp.bfloat16), ws_ref[...],
                      preferred_element_type=jnp.float32)
    else:
        acc = x_f32
    acc = acc + b1_ref[...]

    # fc_0 -> relu -> fc_1, chunked along the hidden dim (static unroll) so the
    # live [tm, chunk] intermediate stays small even for large size_h.
    n_chunks = pl.cdiv(size_h, hidden_chunk)
    for c in range(n_chunks):
        h0 = c * hidden_chunk
        hc = min(hidden_chunk, size_h - h0)
        net = (jnp.dot(a0, w0_ref[:, h0:h0 + hc],
                       preferred_element_type=jnp.float32)
               + b0_ref[:, h0:h0 + hc])
        a1 = jnp.maximum(net, 0.0).astype(jnp.bfloat16)
        acc = acc + jnp.dot(a1, w1_ref[h0:h0 + hc, :],
                            preferred_element_type=jnp.float32)

    out_ref[...] = acc.astype(out_ref.dtype)


def prepare_params(params):
    """One-time parameter prep (hoists per-call casts out of the forward):
    MXU weights -> bf16, biases -> f32 [1, dim]."""
    w0, b0, w1, b1, ws = params
    return (w0.astype(jnp.bfloat16),
            jnp.asarray(b0, jnp.float32).reshape(1, -1),
            w1.astype(jnp.bfloat16),
            jnp.asarray(b1, jnp.float32).reshape(1, -1),
            None if ws is None else ws.astype(jnp.bfloat16))


def resnet_block_fc(x, params, *, tm=512, hidden_chunk=512, out_dtype=None):
    """x: [N, size_in] (f32 or bf16).  params = (w0, b0, w1, b1, ws_or_None)
    with weights stored transposed as [in, out] (ideally via prepare_params).
    Returns [N, size_out] in out_dtype (default: x.dtype)."""
    w0, b0, w1, b1, ws = params
    N, size_in = x.shape
    size_h = w0.shape[1]
    size_out = w1.shape[1]
    has_shortcut = ws is not None
    if out_dtype is None:
        out_dtype = x.dtype

    # Defensive dtype normalization (no-ops when prepare_params was used).
    w0 = w0.astype(jnp.bfloat16)
    w1 = w1.astype(jnp.bfloat16)
    b0 = jnp.asarray(b0, jnp.float32).reshape(1, size_h)
    b1 = jnp.asarray(b1, jnp.float32).reshape(1, size_out)
    if has_shortcut:
        ws = ws.astype(jnp.bfloat16)

    # Lane-dense output: pad size_out to a multiple of 128 (only possible in
    # the shortcut case; the identity residual pins size_out == size_in).
    size_out_p = size_out
    if has_shortcut and size_out % 128 != 0:
        size_out_p = _round_up(size_out, 128)
        pad = size_out_p - size_out
        w1 = jnp.pad(w1, ((0, 0), (0, pad)))
        b1 = jnp.pad(b1, ((0, 0), (0, pad)))
        ws = jnp.pad(ws, ((0, 0), (0, pad)))

    # Batch tiling: tm multiple of 8; pad ragged N; keep >= 2 grid steps where
    # possible so a v7x megacore can shard the "parallel" axis over both TCs.
    n_pad = _round_up(N, 8)
    tm_eff = max(8, min(_round_down(tm, 8), n_pad))
    if n_pad // tm_eff < 2 and n_pad >= 16:
        tm_eff = _round_down(n_pad // 2, 8)
    n_pad = _round_up(n_pad, tm_eff)
    grid = (n_pad // tm_eff,)

    x_in = x if n_pad == N else jnp.pad(x, ((0, n_pad - N), (0, 0)))

    # Generation-aware VMEM budget (v5e/v6e: 128 MiB physical, v7x: 64 MiB/TC).
    try:
        vmem_cap = int(pltpu.get_tpu_info().vmem_capacity_bytes)
    except Exception:
        vmem_cap = 64 * 1024 * 1024
    vmem_limit = max(32 * 1024 * 1024,
                     min(vmem_cap * 3 // 4, 100 * 1024 * 1024))

    hidden_chunk = max(1, min(hidden_chunk, size_h))

    def const_spec(shape):
        # Constant index map -> DMA'd once; Buffered(1) -> no double buffer.
        return pl.BlockSpec(shape, lambda i: (0,) * len(shape),
                            pipeline_mode=pl.Buffered(buffer_count=1))

    in_specs = [
        pl.BlockSpec((tm_eff, size_in), lambda i: (i, 0)),
        const_spec((size_in, size_h)), const_spec((1, size_h)),
        const_spec((size_h, size_out_p)), const_spec((1, size_out_p)),
    ]
    inputs = [x_in, w0, b0, w1, b1]
    if has_shortcut:
        in_specs.append(const_spec((size_in, size_out_p)))
        inputs.append(ws)

    kernel = functools.partial(_resnet_block_kernel,
                               has_shortcut=has_shortcut,
                               hidden_chunk=hidden_chunk)

    out = pl.pallas_call(
        kernel,
        out_shape=jax.ShapeDtypeStruct((n_pad, size_out_p), out_dtype),
        grid_spec=pltpu.PrefetchScalarGridSpec(
            num_scalar_prefetch=0,
            grid=grid,
            in_specs=in_specs,
            out_specs=pl.BlockSpec((tm_eff, size_out_p), lambda i: (i, 0)),
        ),
        compiler_params=pltpu.CompilerParams(
            dimension_semantics=("parallel",),
            vmem_limit_bytes=vmem_limit,
        ),
    )(*inputs)

    if n_pad != N or size_out_p != size_out:
        out = out[:N, :size_out]
    return out


def init_params(key, size_in, size_out=None, size_h=None, scale=0.05):
    """Synthetic parameters matching nn.Linear shapes (stored transposed
    [in, out]).  NOTE: PyTorch zero-inits fc_1.weight; random weights are used
    here so the numerical check exercises the full data path — the forward
    math is identical."""
    if size_out is None:
        size_out = size_in
    if size_h is None:
        size_h = min(size_in, size_out)
    ks = jax.random.split(key, 5)

    def w(k, shape):
        return scale * jax.random.normal(k, shape, dtype=jnp.float32)

    w0 = w(ks[0], (size_in, size_h))
    b0 = w(ks[1], (1, size_h))
    w1 = w(ks[2], (size_h, size_out))
    b1 = w(ks[3], (1, size_out))
    ws = w(ks[4], (size_in, size_out)) if size_in != size_out else None
    return (w0, b0, w1, b1, ws)


def reference(x, params):
    """Pure-JAX f32 reference mirroring the PyTorch forward."""
    w0, b0, w1, b1, ws = params
    x = x.astype(jnp.float32)
    net = jnp.maximum(x, 0.0) @ w0 + b0
    dx = jnp.maximum(net, 0.0) @ w1 + b1
    x_s = x @ ws if ws is not None else x
    return x_s + dx


if __name__ == "__main__":
    key = jax.random.PRNGKey(0)
    kx1, kp1, kx2, kp2 = jax.random.split(key, 4)

    # Case 1: size_in != size_out -> shortcut projection path.
    N, size_in, size_h, size_out = 256, 64, 128, 256
    x1 = jax.random.normal(kx1, (N, size_in), dtype=jnp.float32)
    params1 = init_params(kp1, size_in, size_out, size_h)
    prep1 = prepare_params(params1)            # one-time bf16 weight prep
    out1 = jax.block_until_ready(resnet_block_fc(x1, prep1))
    ref1 = reference(x1, params1)
    assert out1.shape == (N, size_out) and out1.dtype == jnp.float32
    assert jnp.allclose(out1, ref1, atol=2e-2, rtol=2e-2), \
        f"shortcut case: max err {jnp.max(jnp.abs(out1 - ref1))}"

    # Case 2: size_in == size_out -> identity shortcut.
    d = 128
    x2 = jax.random.normal(kx2, (N, d), dtype=jnp.float32)
    params2 = init_params(kp2, d)
    prep2 = prepare_params(params2)
    out2 = jax.block_until_ready(resnet_block_fc(x2, prep2))
    ref2 = reference(x2, params2)
    assert out2.shape == (N, d) and out2.dtype == jnp.float32
    assert jnp.allclose(out2, ref2, atol=2e-2, rtol=2e-2), \
        f"identity case: max err {jnp.max(jnp.abs(out2 - ref2))}"

    # Case 3: low-HBM-traffic mode — bf16 activations in, bf16 out.
    out3 = jax.block_until_ready(
        resnet_block_fc(x2.astype(jnp.bfloat16), prep2, out_dtype=jnp.bfloat16))
    assert out3.shape == (N, d) and out3.dtype == jnp.bfloat16
    assert jnp.allclose(out3.astype(jnp.float32), ref2, atol=6e-2, rtol=6e-2), \
        f"bf16 I/O case: max err {jnp.max(jnp.abs(out3.astype(jnp.float32) - ref2))}"

    print("KERNEL_OK")
</pallas_src>

<mosaic_0001>
module attributes {stable_mosaic.version = 11 : i64} {
  func.func @_resnet_block_kernel(%arg0: i32, %arg1: memref<128x64xf32, #tpu.memory_space<vmem>>, %arg2: memref<64x128xbf16, #tpu.memory_space<vmem>>, %arg3: memref<1x128xf32, #tpu.memory_space<vmem>>, %arg4: memref<128x256xbf16, #tpu.memory_space<vmem>>, %arg5: memref<1x256xf32, #tpu.memory_space<vmem>>, %arg6: memref<64x256xbf16, #tpu.memory_space<vmem>>, %arg7: memref<128x256xf32, #tpu.memory_space<vmem>>) attributes {dimension_semantics = [#tpu.dimension_semantics<parallel>], iteration_bounds = array<i64: 2>, scalar_prefetch = 0 : i64, scratch_operands = 0 : i64, tpu.core_type = #tpu.core_type<tc>, window_params = [{transform_indices = @transform_0, window_bounds = array<i64: 128, 64>}, {pipeline_mode = #tpu.pipeline_mode<synchronous>, transform_indices = @transform_1, window_bounds = array<i64: 64, 128>}, {pipeline_mode = #tpu.pipeline_mode<synchronous>, transform_indices = @transform_2, window_bounds = array<i64: 1, 128>}, {pipeline_mode = #tpu.pipeline_mode<synchronous>, transform_indices = @transform_3, window_bounds = array<i64: 128, 256>}, {pipeline_mode = #tpu.pipeline_mode<synchronous>, transform_indices = @transform_4, window_bounds = array<i64: 1, 256>}, {pipeline_mode = #tpu.pipeline_mode<synchronous>, transform_indices = @transform_5, window_bounds = array<i64: 64, 256>}, {transform_indices = @transform_6, window_bounds = array<i64: 128, 256>}]} {
    %c0 = arith.constant 0 : index
    %c0_0 = arith.constant 0 : index
    %0 = vector.load %arg1[%c0, %c0_0] : memref<128x64xf32, #tpu.memory_space<vmem>>, vector<128x64xf32>
    %cst = arith.constant 0.000000e+00 : f32
    %1 = vector.broadcast %cst : f32 to vector<128x64xf32>
    %2 = arith.maximumf %0, %1 : vector<128x64xf32>
    %3 = arith.truncf %2 : vector<128x64xf32> to vector<128x64xbf16>
    %c0_1 = arith.constant 0 : index
    %c0_2 = arith.constant 0 : index
    %4 = vector.load %arg1[%c0_1, %c0_2] : memref<128x64xf32, #tpu.memory_space<vmem>>, vector<128x64xf32>
    %5 = arith.truncf %4 : vector<128x64xf32> to vector<128x64xbf16>
    %c0_3 = arith.constant 0 : index
    %c0_4 = arith.constant 0 : index
    %6 = vector.load %arg6[%c0_3, %c0_4] : memref<64x256xbf16, #tpu.memory_space<vmem>>, vector<64x256xbf16>
    %cst_5 = arith.constant dense<0.000000e+00> : vector<128x256xf32>
    %7 = tpu.matmul %5, %6, %cst_5 {dimension_numbers = #tpu.dot_dimension_numbers<[1], [0], [0], [1], [0, 0, 1, 1], [], []>} : vector<128x64xbf16>, vector<64x256xbf16>, vector<128x256xf32> -> vector<128x256xf32>
    %c0_6 = arith.constant 0 : index
    %c0_7 = arith.constant 0 : index
    %8 = vector.load %arg5[%c0_6, %c0_7] : memref<1x256xf32, #tpu.memory_space<vmem>>, vector<1x256xf32>
    %9 = vector.broadcast %8 : vector<1x256xf32> to vector<128x256xf32>
    %10 = arith.addf %7, %9 : vector<128x256xf32>
    %c0_8 = arith.constant 0 : index
    %c0_9 = arith.constant 0 : index
    %11 = vector.load %arg2[%c0_8, %c0_9] : memref<64x128xbf16, #tpu.memory_space<vmem>>, vector<64x128xbf16>
    %cst_10 = arith.constant dense<0.000000e+00> : vector<128x128xf32>
    %12 = tpu.matmul %3, %11, %cst_10 {dimension_numbers = #tpu.dot_dimension_numbers<[1], [0], [0], [1], [0, 0, 1, 1], [], []>} : vector<128x64xbf16>, vector<64x128xbf16>, vector<128x128xf32> -> vector<128x128xf32>
    %c0_11 = arith.constant 0 : index
    %c0_12 = arith.constant 0 : index
    %13 = vector.load %arg3[%c0_11, %c0_12] : memref<1x128xf32, #tpu.memory_space<vmem>>, vector<1x128xf32>
    %14 = vector.broadcast %13 : vector<1x128xf32> to vector<128x128xf32>
    %15 = arith.addf %12, %14 : vector<128x128xf32>
    %cst_13 = arith.constant 0.000000e+00 : f32
    %16 = vector.broadcast %cst_13 : f32 to vector<128x128xf32>
    %17 = arith.maximumf %15, %16 : vector<128x128xf32>
    %18 = arith.truncf %17 : vector<128x128xf32> to vector<128x128xbf16>
    %c0_14 = arith.constant 0 : index
    %c0_15 = arith.constant 0 : index
    %19 = vector.load %arg4[%c0_14, %c0_15] : memref<128x256xbf16, #tpu.memory_space<vmem>>, vector<128x256xbf16>
    %cst_16 = arith.constant dense<0.000000e+00> : vector<128x256xf32>
    %20 = tpu.matmul %18, %19, %cst_16 {dimension_numbers = #tpu.dot_dimension_numbers<[1], [0], [0], [1], [0, 0, 1, 1], [], []>} : vector<128x128xbf16>, vector<128x256xbf16>, vector<128x256xf32> -> vector<128x256xf32>
    %21 = arith.addf %10, %20 : vector<128x256xf32>
    %c0_17 = arith.constant 0 : index
    %c0_18 = arith.constant 0 : index
    %22 = vector.load %arg7[%c0_17, %c0_18] : memref<128x256xf32, #tpu.memory_space<vmem>>, vector<128x256xf32>
    tpu.vector_store %arg7[%c0_17, %c0_18], %21 {strides = array<i32>} : memref<128x256xf32, #tpu.memory_space<vmem>>, vector<128x256xf32>,
    return
  }
  func.func @transform_0(%arg0: i32) -> (i32, i32) {
    %c0_i32 = arith.constant 0 : i32
    %c0_i32_0 = arith.constant 0 : i32
    return %arg0, %c0_i32 : i32, i32
  }
  func.func @transform_1(%arg0: i32) -> (i32, i32) {
    %c0_i32 = arith.constant 0 : i32
    %c0_i32_0 = arith.constant 0 : i32
    %c0_i32_1 = arith.constant 0 : i32
    return %c0_i32, %c0_i32_0 : i32, i32
  }
  func.func @transform_2(%arg0: i32) -> (i32, i32) {
    %c0_i32 = arith.constant 0 : i32
    %c0_i32_0 = arith.constant 0 : i32
    %c0_i32_1 = arith.constant 0 : i32
    return %c0_i32, %c0_i32_0 : i32, i32
  }
  func.func @transform_3(%arg0: i32) -> (i32, i32) {
    %c0_i32 = arith.constant 0 : i32
    %c0_i32_0 = arith.constant 0 : i32
    %c0_i32_1 = arith.constant 0 : i32
    return %c0_i32, %c0_i32_0 : i32, i32
  }
  func.func @transform_4(%arg0: i32) -> (i32, i32) {
    %c0_i32 = arith.constant 0 : i32
    %c0_i32_0 = arith.constant 0 : i32
    %c0_i32_1 = arith.constant 0 : i32
    return %c0_i32, %c0_i32_0 : i32, i32
  }
  func.func @transform_5(%arg0: i32) -> (i32, i32) {
    %c0_i32 = arith.constant 0 : i32
    %c0_i32_0 = arith.constant 0 : i32
    %c0_i32_1 = arith.constant 0 : i32
    return %c0_i32, %c0_i32_0 : i32, i32
  }
  func.func @transform_6(%arg0: i32) -> (i32, i32) {
    %c0_i32 = arith.constant 0 : i32
    %c0_i32_0 = arith.constant 0 : i32
    return %arg0, %c0_i32 : i32, i32
  }
}

</mosaic_0001>

<bundles_post_ra>
// kernel: tpu_custom_call.1
= control target key start
LH: loop header
LB: loop body
LE: loop exit
PB: predicated region body
PF: predicated region fallthrough
CT: control target
= control target key end

     0   :  { %11 = vsyncpa [#allocation3], 0  ;;  %s1756_s0 = inlined_call_operand.vmem [shape: f32[256,64], index: 0, kind: input, shape index: {}]   ;;  %s1757_s1 = inlined_call_operand.vmem [shape: bf16[64,128], index: 1, kind: input, shape index: {}]   ;;  %s1758_s2 = inlined_call_operand.vmem [shape: f32[1,128], index: 2, kind: input, shape index: {}]   ;;  %s1759_s3 = inlined_call_operand.vmem [shape: bf16[128,256], index: 3, kind: input, shape index: {}]   ;;  %s1760_s4 = inlined_call_operand.vmem [shape: f32[1,256], index: 4, kind: input, shape index: {}]   ;;  %s1761_s5 = inlined_call_operand.vmem [shape: bf16[64,256], index: 5, kind: input, shape index: {}]   ;;  %s1762_s6 = inlined_call_operand.hbm [shape: f32[256,256], index: 6, kind: output, shape index: {}]  }
   0x1   :  { %13 = vsyncpa [#allocation3 + $0x1], 0  ;;  %s1283_s21 = smov 0   ;;  %s1285_s22 = smov 0  }
   0x2   :  { %s1287_s23 = smov 0   ;;  %s1289_s24 = smov 0  }
   0x3 LB: > { %s1304_s25 = sadd.s32 4294967295, %s1244_s24   ;;  %s949_s26 = sadd.s32 4294967294, %s1244_s24   ;;  %s1244_s24 = sphi %s1289_s24, %s1768_s24   ;;  %s1240_s23 = sphi %s1287_s23, %s1767_s23   ;;  %s1236_s22 = sphi %s1285_s22, %s1766_s22   ;;  %s1232_s21 = sphi %s1283_s21, %s1765_s21  }
   0x4   : > { %s1308_s27 = sadd.s32 1, %s1244_s24   ;;  %s157_s28 = sadd.s32 1, %s1240_s23 }
   0x5   : > { %s154_s29 = ssub.s32 %s1244_s24, %s1308_s27  ;;  %p167_p0 = scmp.ne.s32.totalorder %s1240_s23, %s1236_s22 }
   0x6   : > { %p155_p1 = scmp.eq.s32.totalorder %s154_s29, 0  ;;  %p168_p2 = scmp.eq.s32.totalorder %s1304_s25, 1 }
   0x7   : > { %p173_p3 = scmp.ne.s32.totalorder %s1236_s22, %s1232_s21  ;;  %p174_p4 = scmp.eq.s32.totalorder %s949_s26, 1 }
   0x8   : > { %s1319_s30 = scalar_select %p155_p1, %s1240_s23, %s157_s28  }
   0x9   : > { %p1321_p5 = por %p168_p2, %p167_p0  ;;  %p1325_p6 = por %p174_p4, %p173_p3 }
   0xa   : > { %p952_p7 = scmp.ge.s32.totalorder %s1244_s24, 1  ;;  %p216_p8 = scmp.lt.s32.totalorder %s1244_s24, 3 }
   0xc   : > { %p217_p9 = pnand %p952_p7, %p216_p8 }
   0xd   : > { %s954_s17 = sshll.u32 (!%p217_p9), %s1304_s25, 4  ;;  %s243_s18 = sand.u32 (!%p217_p9), 1, %s1236_s22  }
   0xe   : > { %220 = sbr.rel (%p217_p9) target bundleno = 473 (0x1d9), region = 44  ;;  %p247_p10 = scmp.lt.s32.totalorder (!%p217_p9), %s954_s17, 31 }
   0xf   : > { %s953_s19 = sshll.u32 (!%p217_p9), %s243_s18, 8  ;;  %s1127_s26 = sshll.u32 (!%p217_p9), %s1304_s25, 8 }
  0x10   : > { %s1645_s20 = scalar_lea.vmem (!%p217_p9), [#allocation2], %s953_s19  ;;  %s883_s9 = scalar_lea.hbm (!%p217_p9), %s1762_s6, %s1127_s26 }
  0x11   : > { %s884_s10 = sshll.u32 (!%p217_p9), %s1645_s20, 4  ;;  %s886_s11 = sshll.u32 (!%p217_p9), %s883_s9, 4  ;;  %s885_s10 = int_to_ptr.vmem [resolvable:$true] %s884_s10  ;;  %s887_s11 = int_to_ptr.hbm [resolvable:$true] %s886_s11 }
  0x12   : > { %s871_s25 = scalar_lea.sflag (!%p217_p9), [#allocation3], %s243_s18  ;;  %s1196_s12 = sshra.s32 (!%p217_p9), %s887_s11, 4  ;;  %s1197_s12 = int_to_ptr.hbm [resolvable:$true] %s1196_s12 }
  0x13   : > { %v982_v0 = vld [vmem:[%s1761_s5 + $0x30] sm:$0xf]  ;;  %v1105_v1 = vld [vmem:[%s1761_s5 + $0x34] sm:$0xf0]  ;;  %v974_v2 = vld [vmem:[%s1761_s5 + $0x20] sm:$0xf]  ;;  %p1203_p0 = scmp.lt.s32.totalorder %s1197_s12, %s1762_s6 }
  0x14   : > { %v983_v3 = vor.u32 %v1105_v1, %v982_v0  ;;  %v1103_v4 = vld [vmem:[%s1761_s5 + $0x24] sm:$0xf0]  ;;  %v966_v6 = vld [vmem:[%s1761_s5 + $0x10] sm:$0xf]  ;;  %v1101_v7 = vld [vmem:[%s1761_s5 + $0x14] sm:$0xf0] }
  0x15   : > { %v975_v5 = vor.u32 %v1103_v4, %v974_v2  ;;  %s1770_s17 = smov (!%p247_p10, %s954_s17), 31  ;;  %v967_v8 = vor.u32 %v1101_v7, %v966_v6  ;;  %v958_v9 = vld [vmem:[%s1761_s5] sm:$0xf]  ;;  %v1099_v10 = vld [vmem:[%s1761_s5 + $0x4] sm:$0xf0]  ;;  %v1109_v14 = vld [vmem:[%s1757_s1 + $0x18] sm:$0xff] }
  0x16   : > { %1129 = vmatpush.bf16.msra.mxu2 %v983_v3  ;;  %1128 = vmatpush.bf16.msra.mxu1 %v983_v3  ;;  %s955_s28 = sshll.u32 %s1770_s17, 3  ;;  %v959_v11 = vor.u32 %v1099_v10, %v958_v9  ;;  %vm356_vm0 = vcmask 523264   ;;  %v1108_v16 = vld [vmem:[%s1757_s1 + $0x10] sm:$0xff]  ;;  %v1107_v17 = vld [vmem:[%s1757_s1 + $0x8] sm:$0xff]  ;;  %v1106_v18 = vld [vmem:[%s1757_s1] sm:$0xff]  ;;  %s1198_s13 = scalar_lea.hbm %s1197_s12, 256 }
  0x17   : > { %385 = vmatpush.bf16.msra.mxu0 %v983_v3  ;;  %1130 = vmatpush.bf16.msra.mxu3 %v983_v3  ;;  %s1359_s14 = scalar_lea.vmem %s1756_s0, %s955_s28  ;;  %v1104_v48 = vld [vmem:[%s1761_s5 + $0x34] sm:$0xf]  ;;  %v984_v49 = vld [vmem:[%s1761_s5 + $0x38] sm:$0xf0]  ;;  %v1102_v56 = vld [vmem:[%s1761_s5 + $0x24] sm:$0xf]  ;;  %p1199_p11 = scmp.ne.s32.totalorder %s1197_s12, %s1198_s13 }
  0x18   : > { %v1362_v12 = vld [vmem:[%s1359_s14 + $0x50] sm:$0xff]  ;;  %v265_v13 = vld [vmem:[%s1359_s14 + $0x58] sm:$0xff]  ;;  %v1383_v19 = vld [vmem:[%s1359_s14 + $0x60] sm:$0xff]  ;;  %v987_v50 = vor.u32 %v1104_v48, %v984_v49 }
  0x19   : > { %v1369_v15 = vpack.c.bf16 %v265_v13, %v1362_v12  ;;  %v1386_v20 = vld [vmem:[%s1359_s14 + $0x68] sm:$0xff]  ;;  %v254_v22 = vld [vmem:[%s1359_s14] sm:$0xff]  ;;  %v1398_v27 = vld [vmem:[%s1359_s14 + $0x10] sm:$0xff]  ;;  %v280_v51 = vmax.f32 %v1362_v12, 0.0  ;;  %v281_v52 = vmax.f32 %v265_v13, 0.0  ;;  %v282_v10 = vmax.f32 %v1383_v19, 0.0  ;;  %p1200_p12 = pnand %p1199_p11, %p1321_p5 }
  0x1a   : > { %1132 = vmatpush.bf16.msra.mxu2 %v975_v5  ;;  %1131 = vmatpush.bf16.msra.mxu1 %v975_v5  ;;  %v1390_v21 = vpack.c.bf16 %v1386_v20, %v1383_v19  ;;  %v255_v23 = vld [vmem:[%s1359_s14 + $0x8] sm:$0xff]  ;;  %v270_v24 = vmax.f32 %v254_v22, 0.0  ;;  %v1401_v28 = vld [vmem:[%s1359_s14 + $0x18] sm:$0xff]  ;;  %v272_v29 = vmax.f32 %v1398_v27, 0.0  ;;  %v258_v32 = vld [vmem:[%s1359_s14 + $0x20] sm:$0xff] }
  0x1b   : > { %386 = vmatpush.bf16.msra.mxu0 %v975_v5  ;;  %1133 = vmatpush.bf16.msra.mxu3 %v975_v5  ;;  %v271_v25 = vmax.f32 %v255_v23, 0.0  ;;  %v273_v30 = vmax.f32 %v1401_v28, 0.0  ;;  %v259_v33 = vld [vmem:[%s1359_s14 + $0x28] sm:$0xff]  ;;  %v274_v34 = vmax.f32 %v258_v32, 0.0  ;;  %v260_v37 = vld [vmem:[%s1359_s14 + $0x30] sm:$0xff]  ;;  %v261_v38 = vld [vmem:[%s1359_s14 + $0x38] sm:$0xff]  ;;  %v291_v53 = vpack.c.bf16 %v281_v52, %v280_v51  ;;  %p1201_p13 = pneg %p1200_p12 }
  0x1c   : > { %v275_v35 = vmax.f32 %v259_v33, 0.0  ;;  %v276_v39 = vmax.f32 %v260_v37, 0.0  ;;  %v277_v40 = vmax.f32 %v261_v38, 0.0  ;;  %v1412_v42 = vpack.c.bf16 %v259_v33, %v258_v32  ;;  %v262_v43 = vld [vmem:[%s1359_s14 + $0x40] sm:$0xff]  ;;  %v263_v44 = vld [vmem:[%s1359_s14 + $0x48] sm:$0xff]  ;;  %v1454_v1 = vld [vmem:[%s1359_s14 + $0x70] sm:$0xff] }
  0x1d   : > { %v286_v26 = vpack.c.bf16 %v271_v25, %v270_v24  ;;  %v287_v31 = vpack.c.bf16 %v273_v30, %v272_v29  ;;  %v278_v45 = vmax.f32 %v262_v43, 0.0  ;;  %v279_v46 = vmax.f32 %v263_v44, 0.0  ;;  %v976_v57 = vld [vmem:[%s1761_s5 + $0x28] sm:$0xf0]  ;;  %v1086_v58 = vld [vmem:[%s1759_s3 + $0x70] sm:$0xf] }
  0x1e   : > { %1135 = vmatpush.bf16.msra.mxu2 %v967_v8  ;;  %1134 = vmatpush.bf16.msra.mxu1 %v967_v8  ;;  %v288_v36 = vpack.c.bf16 %v275_v35, %v274_v34  ;;  %v289_v41 = vpack.c.bf16 %v277_v40, %v276_v39  ;;  %v1426_v54 = vpack.c.bf16 %v261_v38, %v260_v37  ;;  %v1125_v60 = vld [vmem:[%s1759_s3 + $0x74] sm:$0xf0]  ;;  %v1124_v61 = vld [vmem:[%s1759_s3 + $0x74] sm:$0xf]  ;;  %v1088_v62 = vld [vmem:[%s1759_s3 + $0x78] sm:$0xf0] }
  0x1f   : > { %387 = vmatpush.bf16.msra.mxu0 %v967_v8  ;;  %1136 = vmatpush.bf16.msra.mxu3 %v967_v8  ;;  %v290_v47 = vpack.c.bf16 %v279_v46, %v278_v45  ;;  %v1428_v55 = vpack.c.bf16 %v255_v23, %v254_v22  ;;  %v979_v59 = vor.u32 %v1102_v56, %v976_v57  ;;  %v1457_v2 = vld [vmem:[%s1359_s14 + $0x78] sm:$0xff]  ;;  %v1078_v3 = vld [vmem:[%s1759_s3 + $0x60] sm:$0xf]  ;;  %v1123_v4 = vld [vmem:[%s1759_s3 + $0x64] sm:$0xf0]  ;;  %v284_v48 = vmax.f32 %v1454_v1, 0.0 }
  0x20   : > { %v1087_v63 = vor.u32 %v1125_v60, %v1086_v58  ;;  %v1091_v0 = vor.u32 %v1124_v61, %v1088_v62  ;;  %v1122_v5 = vld [vmem:[%s1759_s3 + $0x64] sm:$0xf]  ;;  %v1470_v6 = vpack.c.bf16 %v1457_v2, %v1454_v1  ;;  %v1079_v7 = vor.u32 %v1123_v4, %v1078_v3  ;;  %v1080_v8 = vld [vmem:[%s1759_s3 + $0x68] sm:$0xf0]  ;;  %v1070_v12 = vld [vmem:[%s1759_s3 + $0x50] sm:$0xf] }
  0x21   : > { %v1083_v9 = vor.u32 %v1122_v5, %v1080_v8  ;;  %v1121_v13 = vld [vmem:[%s1759_s3 + $0x54] sm:$0xf0]  ;;  %v1100_v22 = vld [vmem:[%s1761_s5 + $0x14] sm:$0xf]  ;;  %v968_v23 = vld [vmem:[%s1761_s5 + $0x18] sm:$0xf0]  ;;  %v295_v25 = vpack.c.bf16 %v1401_v28, %v1398_v27 }
  0x22   : > { %1138 = vmatpush.bf16.msra.mxu2 %v959_v11  ;;  %1137 = vmatpush.bf16.msra.mxu1 %v959_v11  ;;  %v1062_v24 = vld [vmem:[%s1759_s3 + $0x40] sm:$0xf]  ;;  %v1119_v29 = vld [vmem:[%s1759_s3 + $0x44] sm:$0xf0]  ;;  %v1118_v30 = vld [vmem:[%s1759_s3 + $0x44] sm:$0xf] }
  0x23   : > { %388 = vmatpush.bf16.msra.mxu0 %v959_v11  ;;  %1139 = vmatpush.bf16.msra.mxu3 %v959_v11  ;;  %v283_v11 = vmax.f32 %v1386_v20, 0.0  ;;  %v1491_v20 = vpack.c.bf16 %v263_v44, %v262_v43  ;;  %v1063_v32 = vor.u32 %v1119_v29, %v1062_v24  ;;  %v1054_v27 = vld [vmem:[%s1759_s3 + $0x30] sm:$0xf]  ;;  %v1117_v28 = vld [vmem:[%s1759_s3 + $0x34] sm:$0xf0]  ;;  %v285_v49 = vmax.f32 %v1457_v2, 0.0 }
  0x24   : > { %v1116_v34 = vld [vmem:[%s1759_s3 + $0x34] sm:$0xf]  ;;  %v1055_v35 = vor.u32 %v1117_v28, %v1054_v27  ;;  %v1046_v39 = vld [vmem:[%s1759_s3 + $0x20] sm:$0xf]  ;;  %v1115_v40 = vld [vmem:[%s1759_s3 + $0x24] sm:$0xf0] }
  0x25   : > { %993 = vmatmul.msk.bf16.vlgmr.msra.gmra.mxu2 %vm356_vm0, %v1369_v15  ;;  %990 = vmatmul.msk.bf16.vlgmr.msra.gmra.mxu1 %vm356_vm0, %v1412_v42  ;;  %v292_v19 = vpack.c.bf16 %v283_v11, %v282_v10  ;;  %v1047_v43 = vor.u32 %v1115_v40, %v1046_v39  ;;  %v1048_v44 = vld [vmem:[%s1759_s3 + $0x28] sm:$0xf0]  ;;  %v1098_v46 = vld [vmem:[%s1761_s5 + $0x4] sm:$0xf]  ;;  %v1038_v51 = vld [vmem:[%s1759_s3 + $0x10] sm:$0xf]  ;;  %v293_v60 = vpack.c.bf16 %v285_v49, %v284_v48 }
  0x26   : > { %543 = vmatpush.bf16.msrb.mxu2 %v1109_v14  ;;  %434 = vmatpush.bf16.msrb.mxu1 %v987_v50  ;;  %v1120_v14 = vld [vmem:[%s1759_s3 + $0x54] sm:$0xf]  ;;  %v1113_v52 = vld [vmem:[%s1759_s3 + $0x14] sm:$0xf0]  ;;  %v1040_v57 = vld [vmem:[%s1759_s3 + $0x18] sm:$0xf0] }
  0x27   : > { %988 = vmatmul.msk.bf16.vlgmr.msra.gmra.mxu0 %vm356_vm0, %v1428_v55  ;;  %708 = vmatpush.bf16.msrb.mxu3 %v1087_v63  ;;  %v1039_v56 = vor.u32 %v1113_v52, %v1038_v51  ;;  %v1030_v61 = vld [vmem:[%s1759_s3] sm:$0xf]  ;;  %v1111_v62 = vld [vmem:[%s1759_s3 + $0x4] sm:$0xf0]  ;;  %v1110_v63 = vld [vmem:[%s1759_s3 + $0x4] sm:$0xf] }
  0x28   : > { %757 = vmatpush.bf16.msrb.mxu0 %v1091_v0  ;;  %995 = vmatmul.msk.bf16.vlgmr.msra.gmra.mxu3 %vm356_vm0, %v1470_v6  ;;  %v1031_v0 = vor.u32 %v1111_v62, %v1030_v61  ;;  %v1032_v1 = vld [vmem:[%s1759_s3 + $0x8] sm:$0xf0]  ;;  %s1202_s14 = scalar_lea.hbm %s1762_s6, 512 }
  0x29   : > { %v1035_v2 = vor.u32 %v1110_v63, %v1032_v1  ;;  %p1204_p1 = scmp.lt.s32.totalorder %s1202_s14, %s1198_s13 }
  0x2a   : > { %544 = vmatpush.bf16.msrb.mxu2 %v1108_v16  ;;  %435 = vmatpush.bf16.msrb.mxu1 %v979_v59  ;;  %v1071_v16 = vor.u32 %v1121_v13, %v1070_v12 }
  0x2b   : > { %709 = vmatpush.bf16.msrb.mxu3 %v1079_v7  ;;  %v1588_v7 = vld [vmem:[%s1758_s2] ss:$0 sm:$0xff]  ;;  %p1205_p2 = por %p1204_p1, %p1203_p0 }
  0x2c   : > { %758 = vmatpush.bf16.msrb.mxu0 %v1083_v9 }
  0x2d   : > { %p1206_p3 = pnand %p1205_p2, %p1201_p13 }
  0x2e   : > { %545 = vmatpush.bf16.msrb.mxu2 %v1107_v17  ;;  %v1072_v17 = vld [vmem:[%s1759_s3 + $0x58] sm:$0xf0] }
  0x2f   : > { %710 = vmatpush.bf16.msrb.mxu3 %v1071_v16 }
  0x32   : > { %546 = vmatpush.bf16.msrb.mxu2 %v1106_v18  ;;  %v1075_v18 = vor.u32 %v1120_v14, %v1072_v17 }
  0x33   : > { %711 = vmatpush.bf16.msrb.mxu3 %v1063_v32 }
  0x34   : > { %759 = vmatpush.bf16.msrb.mxu0 %v1075_v18 }
  0x35   : > { %994 = vmatmul.msk.bf16.gmra.mxu2 %vm356_vm0, %v1390_v21  ;;  %991 = vmatmul.msk.bf16.gmra.mxu1 %vm356_vm0, %v1426_v54 }
  0x37   : > { %989 = vmatmul.msk.bf16.gmra.mxu0 %vm356_vm0, %v295_v25  ;;  %712 = vmatpush.bf16.msrb.mxu3 %v1055_v35 }
  0x3b   : > { %713 = vmatpush.bf16.msrb.mxu3 %v1047_v43 }
  0x3f   : > { %714 = vmatpush.bf16.msrb.mxu3 %v1039_v56 }
  0x43   : > { %715 = vmatpush.bf16.msrb.mxu3 %v1031_v0 }
  0x45   : > { %1020 = vmatmul.msk.bf16.vlgmr.msrb.gmra.mxu2 %vm356_vm0, %v286_v26  ;;  %v971_v26 = vor.u32 %v1100_v22, %v968_v23  ;;  %992 = vmatmul.msk.bf16.gmra.mxu1 %vm356_vm0, %v1491_v20 }
  0x47   : > { %436 = vmatpush.bf16.msrb.mxu1 %v971_v26 }
  0x55   : > { %1021 = vmatmul.msk.bf16.gmra.mxu2 %vm356_vm0, %v287_v31  ;;  %v1064_v31 = vld [vmem:[%s1759_s3 + $0x48] sm:$0xf0] }
  0x56   : > { %v1067_v33 = vor.u32 %v1118_v30, %v1064_v31 }
  0x58   : > { %760 = vmatpush.bf16.msrb.mxu0 %v1067_v33 }
  0x65   : > { %1022 = vmatmul.msk.bf16.gmra.mxu2 %vm356_vm0, %v288_v36  ;;  %v1056_v36 = vld [vmem:[%s1759_s3 + $0x38] sm:$0xf0] }
  0x66   : > { %v1059_v37 = vor.u32 %v1116_v34, %v1056_v36 }
  0x68   : > { %761 = vmatpush.bf16.msrb.mxu0 %v1059_v37 }
  0x75   : > { %1023 = vmatmul.msk.bf16.gmra.mxu2 %vm356_vm0, %v289_v41  ;;  %v1114_v41 = vld [vmem:[%s1759_s3 + $0x24] sm:$0xf] }
  0x76   : > { %v1051_v45 = vor.u32 %v1114_v41, %v1048_v44 }
  0x78   : > { %762 = vmatpush.bf16.msrb.mxu0 %v1051_v45 }
  0x85   : > { %1024 = vmatmul.msk.bf16.gmra.mxu2 %vm356_vm0, %v290_v47  ;;  %v960_v47 = vld [vmem:[%s1761_s5 + $0x8] sm:$0xf0] }
  0x86   : > { %v963_v50 = vor.u32 %v1098_v46, %v960_v47 }
  0x88   : > { %437 = vmatpush.bf16.msrb.mxu1 %v963_v50 }
  0x8b   : > { %996 = vmatmul.msk.bf16.vlgmr.msrb.gmra.mxu1 %vm356_vm0, %v1428_v55 }
  0x95   : > { %1025 = vmatmul.msk.bf16.gmra.mxu2 %vm356_vm0, %v291_v53  ;;  %v1112_v53 = vld [vmem:[%s1759_s3 + $0x14] sm:$0xf] }
  0x96   : > { %v1043_v58 = vor.u32 %v1112_v53, %v1040_v57 }
  0x98   : > { %763 = vmatpush.bf16.msrb.mxu0 %v1043_v58 }
  0x9b   : > { %997 = vmatmul.msk.bf16.gmra.mxu1 %vm356_vm0, %v295_v25 }
  0x9c   : > { %764 = vmatpush.bf16.msrb.mxu0 %v1035_v2 }
  0xa2   : > { %v1602_v32 = vpop.f32.mrf.mxu1 }
  0xa4   : > { %v390_v57 = vpop.f32.mrf.mxu0 }
  0xa5   : > { %1026 = vmatmul.msk.bf16.gmra.mxu2 %vm356_vm0, %v292_v19 }
  0xa8   : > { %v1529_v38 = vpop.f32.mrf.mxu2 }
  0xab   : > { %998 = vmatmul.msk.bf16.gmra.mxu1 %vm356_vm0, %v1412_v42 }
  0xb0   : > { %v1563_v59 = vpop.f32.mrf.mxu2 }
  0xb5   : > { %1027 = vmatmul.msk.bf16.gmra.mxu2 %vm356_vm0, %v293_v60 }
  0xb8   : > { %v1580_v3 = vpop.f32.mrf.mxu2 }
  0xbb   : > { %999 = vmatmul.msk.bf16.gmra.mxu1 %vm356_vm0, %v1426_v54 }
  0xc0   : > { %v1582_v4 = vpop.f32.mrf.mxu2 }
  0xc8   : > { %v548_v5 = vpop.f32.mrf.mxu2 }
  0xc9   : > { %v549_v8 = vadd.f32 %v1588_v7, %v548_v5 }
  0xcb   : > { %v588_v10 = vmax.f32 %v549_v8, 0.0  ;;  %1000 = vmatmul.msk.bf16.gmra.mxu1 %vm356_vm0, %v1491_v20  ;;  %v1608_v20 = vpop.f32.mrf.mxu1 }
  0xd0   : > { %v550_v55 = vpop.f32.mrf.mxu2 }
  0xd1   : > { %v551_v9 = vadd.f32 %v1588_v7, %v550_v55 }
  0xd3   : > { %v589_v11 = vmax.f32 %v551_v9, 0.0  ;;  %v1611_v40 = vpop.f32.mrf.mxu1 }
  0xd5   : > { %v604_v12 = vpack.c.bf16 %v589_v11, %v588_v10 }
  0xd7   : > { %716 = vmatmul.bf16.vlgmr.msrb.gmra.mxu3 %v604_v12  ;;  %765 = vmatmul.bf16.vlgmr.msrb.gmra.mxu0 %v604_v12 }
  0xd8   : > { %v553_v13 = vpop.f32.mrf.mxu2 }
  0xd9   : > { %v554_v14 = vadd.f32 %v1588_v7, %v553_v13 }
  0xdb   : > { %v590_v18 = vmax.f32 %v554_v14, 0.0  ;;  %1001 = vmatmul.msk.bf16.gmra.mxu1 %vm356_vm0, %v1369_v15  ;;  %v1616_v46 = vpop.f32.mrf.mxu1 }
  0xe0   : > { %v555_v16 = vpop.f32.mrf.mxu2 }
  0xe1   : > { %v556_v17 = vadd.f32 %v1588_v7, %v555_v16  ;;  %v1630_v16 = vpop.f32.mrf.mxu3 }
  0xe3   : > { %v591_v19 = vmax.f32 %v556_v17, 0.0  ;;  %v1619_v49 = vpop.f32.mrf.mxu1  ;;  %v310_v17 = vld [vmem:[%s1760_s4] sm:$0x3] }
  0xe5   : > { %v605_v22 = vpack.c.bf16 %v591_v19, %v590_v18  ;;  %v1635_v19 = vperm.slane %v310_v17, 1 }
  0xe7   : > { %721 = vmatmul.bf16.gmra.mxu3 %v605_v22  ;;  %770 = vmatmul.bf16.gmra.mxu0 %v605_v22 }
  0xe8   : > { %v558_v23 = vpop.f32.mrf.mxu2 }
  0xe9   : > { %v559_v42 = vadd.f32 %v1588_v7, %v558_v23  ;;  %v1641_v23 = vpop.f32.mrf.mxu3 }
  0xeb   : > { %v592_v26 = vmax.f32 %v559_v42, 0.0  ;;  %1002 = vmatmul.msk.bf16.gmra.mxu1 %vm356_vm0, %v1390_v21  ;;  %v1624_v56 = vpop.f32.mrf.mxu1 }
  0xf0   : > { %v560_v24 = vpop.f32.mrf.mxu2 }
  0xf1   : > { %v561_v25 = vadd.f32 %v1588_v7, %v560_v24 }
  0xf3   : > { %v593_v29 = vmax.f32 %v561_v25, 0.0  ;;  %v1643_v25 = vperm.slane %v310_v17, 0 }
  0xf5   : > { %v606_v30 = vpack.c.bf16 %v593_v29, %v592_v26  ;;  %v391_v26 = vadd.f32 %v390_v57, %v1643_v25 }
  0xf7   : > { %726 = vmatmul.bf16.gmra.mxu3 %v606_v30  ;;  %775 = vmatmul.bf16.gmra.mxu0 %v606_v30 }
  0xf8   : > { %v563_v31 = vpop.f32.mrf.mxu2 }
  0xf9   : > { %v564_v54 = vadd.f32 %v1588_v7, %v563_v31 }
  0xfb   : > { %v594_v28 = vmax.f32 %v564_v54, 0.0  ;;  %1003 = vmatmul.msk.bf16.gmra.mxu1 %vm356_vm0, %v1470_v6  ;;  %v392_v6 = vpop.f32.mrf.mxu0 }
 0x100   : > { %v565_v33 = vpop.f32.mrf.mxu2 }
 0x101   : > { %v566_v27 = vadd.f32 %v1588_v7, %v565_v33 }
 0x103   : > { %v595_v34 = vmax.f32 %v566_v27, 0.0  ;;  %v395_v10 = vpop.f32.mrf.mxu0 }
 0x105   : > { %v607_v35 = vpack.c.bf16 %v595_v34, %v594_v28  ;;  %v393_v28 = vadd.f32 %v392_v6, %v1643_v25  ;;  %v403_v6 = vadd.f32 %v1608_v20, %v1643_v25 }
 0x107   : > { %731 = vmatmul.bf16.gmra.mxu3 %v607_v35  ;;  %780 = vmatmul.bf16.gmra.mxu0 %v607_v35 }
 0x108   : > { %v568_v36 = vpop.f32.mrf.mxu2  ;;  %v439_v62 = vpop.f32.mrf.mxu1 }
 0x109   : > { %v569_v37 = vadd.f32 %v1588_v7, %v568_v36 }
 0x10b   : > { %v596_v43 = vmax.f32 %v569_v37, 0.0  ;;  %v397_v18 = vpop.f32.mrf.mxu0 }
 0x110   : > { %v570_v39 = vpop.f32.mrf.mxu2  ;;  %v441_v5 = vpop.f32.mrf.mxu1 }
 0x111   : > { %v571_v41 = vadd.f32 %v1588_v7, %v570_v39  ;;  %v442_v31 = vadd.f32 %v441_v5, %v1635_v19 }
 0x113   : > { %v597_v44 = vmax.f32 %v571_v41, 0.0 }
 0x115   : > { %v608_v45 = vpack.c.bf16 %v597_v44, %v596_v43  ;;  %v396_v43 = vadd.f32 %v395_v10, %v1643_v25 }
 0x117   : > { %736 = vmatmul.bf16.gmra.mxu3 %v608_v45  ;;  %785 = vmatmul.bf16.gmra.mxu0 %v608_v45 }
 0x118   : > { %v573_v15 = vpop.f32.mrf.mxu2  ;;  %v444_v14 = vpop.f32.mrf.mxu1 }
 0x119   : > { %v574_v47 = vadd.f32 %v1588_v7, %v573_v15  ;;  %v445_v34 = vadd.f32 %v444_v14, %v1635_v19 }
 0x11b   : > { %v598_v51 = vmax.f32 %v574_v47, 0.0 }
 0x120   : > { %v575_v48 = vpop.f32.mrf.mxu2  ;;  %v446_v22 = vpop.f32.mrf.mxu1 }
 0x121   : > { %v576_v50 = vadd.f32 %v1588_v7, %v575_v48  ;;  %v447_v45 = vadd.f32 %v446_v22, %v1635_v19  ;;  %v408_v22 = vadd.f32 %v1616_v46, %v1643_v25 }
 0x123   : > { %v599_v52 = vmax.f32 %v576_v50, 0.0 }
 0x125   : > { %v609_v53 = vpack.c.bf16 %v599_v52, %v598_v51  ;;  %v398_v51 = vadd.f32 %v397_v18, %v1643_v25 }
 0x127   : > { %741 = vmatmul.bf16.gmra.mxu3 %v609_v53  ;;  %790 = vmatmul.bf16.gmra.mxu0 %v609_v53 }
 0x128   : > { %v578_v21 = vpop.f32.mrf.mxu2  ;;  %v449_v30 = vpop.f32.mrf.mxu1 }
 0x129   : > { %v579_v58 = vadd.f32 %v1588_v7, %v578_v21  ;;  %v450_v52 = vadd.f32 %v449_v30, %v1635_v19  ;;  %v411_v30 = vadd.f32 %v1619_v49, %v1643_v25 }
 0x12b   : > { %v600_v63 = vmax.f32 %v579_v58, 0.0 }
 0x130   : > { %v580_v60 = vpop.f32.mrf.mxu2  ;;  %v451_v39 = vpop.f32.mrf.mxu1 }
 0x131   : > { %v581_v61 = vadd.f32 %v1588_v7, %v580_v60 }
 0x133   : > { %v601_v0 = vmax.f32 %v581_v61, 0.0  ;;  %v401_v61 = vadd.f32 %v1602_v32, %v1643_v25 }
 0x135   : > { %v610_v1 = vpack.c.bf16 %v601_v0, %v600_v63  ;;  %v452_v63 = vadd.f32 %v451_v39, %v1635_v19 }
 0x137   : > { %746 = vmatmul.bf16.gmra.mxu3 %v610_v1  ;;  %795 = vmatmul.bf16.gmra.mxu0 %v610_v1 }
 0x138   : > { %v583_v2 = vpop.f32.mrf.mxu2  ;;  %v454_v50 = vpop.f32.mrf.mxu1 }
 0x139   : > { %v584_v8 = vadd.f32 %v1588_v7, %v583_v2  ;;  %v455_v5 = vadd.f32 %v454_v50, %v1635_v19 }
 0x13b   : > { %v602_v11 = vmax.f32 %v584_v8, 0.0 }
 0x140   : > { %v585_v55 = vpop.f32.mrf.mxu2  ;;  %v456_v60 = vpop.f32.mrf.mxu1 }
 0x141   : > { %v586_v9 = vadd.f32 %v1588_v7, %v585_v55  ;;  %v440_v7 = vadd.f32 %v439_v62, %v1635_v19 }
 0x143   : > { %v603_v12 = vmax.f32 %v586_v9, 0.0 }
 0x145   : > { %v611_v13 = vpack.c.bf16 %v603_v12, %v602_v11  ;;  %v406_v11 = vadd.f32 %v1611_v40, %v1643_v25 }
 0x147   : > { %751 = vmatmul.bf16.gmra.mxu3 %v611_v13  ;;  %800 = vmatmul.bf16.gmra.mxu0 %v611_v13  ;;  %v457_v13 = vadd.f32 %v456_v60, %v1635_v19 }
 0x148   : > { %v459_v55 = vpop.f32.mrf.mxu1 }
 0x150   : > { %v461_v17 = vpop.f32.mrf.mxu1 }
 0x154   : > { %v766_v42 = vpop.f32.mrf.mxu0 }
 0x155   : > { %v807_v24 = vadd.f32 %v766_v42, %v440_v7  ;;  %v460_v7 = vadd.f32 %v459_v55, %v1635_v19  ;;  %v426_v55 = vadd.f32 %v1630_v16, %v1643_v25  ;;  %v428_v16 = vadd.f32 %v1641_v23, %v1643_v25 }
 0x157   : > { %839 = vst [vmem:[%s1645_s20 + $0x8] sm:$0xff] %v807_v24 }
 0x15a   : > { %v717_v29 = vpop.f32.mrf.mxu3 }
 0x15b   : > { %v806_v54 = vadd.f32 %v717_v29, %v391_v26  ;;  %v464_v29 = vpop.f32.mrf.mxu1 }
 0x15c   : > { %v768_v33 = vpop.f32.mrf.mxu0 }
 0x15d   : > { %838 = vst [vmem:[%s1645_s20] sm:$0xff] %v806_v54  ;;  %v809_v27 = vadd.f32 %v768_v33, %v442_v31  ;;  %v462_v54 = vadd.f32 %v461_v17, %v1635_v19 }
 0x15f   : > { %841 = vst [vmem:[%s1645_s20 + $0x18] sm:$0xff] %v809_v27 }
 0x162   : > { %v719_v35 = vpop.f32.mrf.mxu3 }
 0x163   : > { %v808_v36 = vadd.f32 %v719_v35, %v393_v28  ;;  %v466_v28 = vpop.f32.mrf.mxu1  ;;  %v465_v35 = vadd.f32 %v464_v29, %v1635_v19 }
 0x164   : > { %v771_v37 = vpop.f32.mrf.mxu0 }
 0x165   : > { %840 = vst [vmem:[%s1645_s20 + $0x10] sm:$0xff] %v808_v36  ;;  %v811_v41 = vadd.f32 %v771_v37, %v445_v34  ;;  %v413_v34 = vadd.f32 %v1624_v56, %v1643_v25 }
 0x167   : > { %843 = vst [vmem:[%s1645_s20 + $0x28] sm:$0xff] %v811_v41  ;;  %v416_v41 = vadd.f32 %v1529_v38, %v1643_v25 }
 0x16a   : > { %v722_v44 = vpop.f32.mrf.mxu3 }
 0x16b   : > { %v810_v15 = vadd.f32 %v722_v44, %v396_v43  ;;  %v469_v44 = vpop.f32.mrf.mxu1 }
 0x16c   : > { %v773_v47 = vpop.f32.mrf.mxu0  ;;  %v470_v50 = vadd.f32 %v469_v44, %v1635_v19 }
 0x16d   : > { %842 = vst [vmem:[%s1645_s20 + $0x20] sm:$0xff] %v810_v15  ;;  %v813_v48 = vadd.f32 %v773_v47, %v447_v45  ;;  %v467_v45 = vadd.f32 %v466_v28, %v1635_v19 }
 0x16f   : > { %845 = vst [vmem:[%s1645_s20 + $0x38] sm:$0xff] %v813_v48  ;;  %v418_v48 = vadd.f32 %v1563_v59, %v1643_v25 }
 0x172   : > { %v724_v53 = vpop.f32.mrf.mxu3 }
 0x173   : > { %v812_v21 = vadd.f32 %v724_v53, %v398_v51  ;;  %v471_v53 = vpop.f32.mrf.mxu1 }
 0x174   : > { %v776_v57 = vpop.f32.mrf.mxu0  ;;  %v472_v60 = vadd.f32 %v471_v53, %v1635_v19 }
 0x175   : > { %844 = vst [vmem:[%s1645_s20 + $0x30] sm:$0xff] %v812_v21  ;;  %v815_v58 = vadd.f32 %v776_v57, %v450_v52  ;;  %v421_v57 = vadd.f32 %v1580_v3, %v1643_v25 }
 0x177   : > { %847 = vst [vmem:[%s1645_s20 + $0x48] sm:$0xff] %v815_v58 }
 0x17a   : > { %v727_v62 = vpop.f32.mrf.mxu3 }
 0x17b   : > { %v814_v0 = vadd.f32 %v727_v62, %v401_v61 }
 0x17c   : > { %v778_v1 = vpop.f32.mrf.mxu0 }
 0x17d   : > { %846 = vst [vmem:[%s1645_s20 + $0x40] sm:$0xff] %v814_v0  ;;  %v817_v2 = vadd.f32 %v778_v1, %v452_v63  ;;  %v474_v63 = vpop.f32.mrf.mxu1  ;;  %v423_v0 = vadd.f32 %v1582_v4, %v1643_v25 }
 0x17e   : > { %v475_v1 = vadd.f32 %v474_v63, %v1635_v19 }
 0x17f   : > { %849 = vst [vmem:[%s1645_s20 + $0x58] sm:$0xff] %v817_v2 }
 0x182   : > { %v729_v8 = vpop.f32.mrf.mxu3 }
 0x183   : > { %v816_v9 = vadd.f32 %v729_v8, %v403_v6 }
 0x184   : > { %v781_v32 = vpop.f32.mrf.mxu0 }
 0x185   : > { %848 = vst [vmem:[%s1645_s20 + $0x50] sm:$0xff] %v816_v9  ;;  %v819_v10 = vadd.f32 %v781_v32, %v455_v5  ;;  %v476_v8 = vpop.f32.mrf.mxu1 }
 0x186   : > { %v477_v4 = vadd.f32 %v476_v8, %v1635_v19 }
 0x187   : > { %851 = vst [vmem:[%s1645_s20 + $0x68] sm:$0xff] %v819_v10 }
 0x18a   : > { %v732_v12 = vpop.f32.mrf.mxu3 }
 0x18b   : > { %v818_v14 = vadd.f32 %v732_v12, %v406_v11 }
 0x18c   : > { %v783_v20 = vpop.f32.mrf.mxu0 }
 0x18d   : > { %850 = vst [vmem:[%s1645_s20 + $0x60] sm:$0xff] %v818_v14  ;;  %v821_v18 = vadd.f32 %v783_v20, %v457_v13 }
 0x18f   : > { %853 = vst [vmem:[%s1645_s20 + $0x78] sm:$0xff] %v821_v18 }
 0x192   : > { %v734_v42 = vpop.f32.mrf.mxu3 }
 0x193   : > { %v820_v24 = vadd.f32 %v734_v42, %v408_v22 }
 0x194   : > { %v786_v40 = vpop.f32.mrf.mxu0 }
 0x195   : > { %852 = vst [vmem:[%s1645_s20 + $0x70] sm:$0xff] %v820_v24  ;;  %v823_v26 = vadd.f32 %v786_v40, %v460_v7 }
 0x197   : > { %855 = vst [vmem:[%s1645_s20 + $0x88] sm:$0xff] %v823_v26 }
 0x19a   : > { %v737_v31 = vpop.f32.mrf.mxu3 }
 0x19b   : > { %v822_v33 = vadd.f32 %v737_v31, %v411_v30 }
 0x19c   : > { %v788_v46 = vpop.f32.mrf.mxu0 }
 0x19d   : > { %854 = vst [vmem:[%s1645_s20 + $0x80] sm:$0xff] %v822_v33  ;;  %v825_v27 = vadd.f32 %v788_v46, %v462_v54 }
 0x19f   : > { %857 = vst [vmem:[%s1645_s20 + $0x98] sm:$0xff] %v825_v27 }
 0x1a2   : > { %v739_v36 = vpop.f32.mrf.mxu3 }
 0x1a3   : > { %v824_v37 = vadd.f32 %v739_v36, %v413_v34 }
 0x1a4   : > { %v791_v49 = vpop.f32.mrf.mxu0 }
 0x1a5   : > { %856 = vst [vmem:[%s1645_s20 + $0x90] sm:$0xff] %v824_v37  ;;  %v827_v39 = vadd.f32 %v791_v49, %v465_v35 }
 0x1a7   : > { %859 = vst [vmem:[%s1645_s20 + $0xa8] sm:$0xff] %v827_v39 }
 0x1aa   : > { %v742_v43 = vpop.f32.mrf.mxu3 }
 0x1ab   : > { %v826_v15 = vadd.f32 %v742_v43, %v416_v41 }
 0x1ac   : > { %v793_v56 = vpop.f32.mrf.mxu0 }
 0x1ad   : > { %858 = vst [vmem:[%s1645_s20 + $0xa0] sm:$0xff] %v826_v15  ;;  %v829_v47 = vadd.f32 %v793_v56, %v467_v45 }
 0x1af   : > { %861 = vst [vmem:[%s1645_s20 + $0xb8] sm:$0xff] %v829_v47 }
 0x1b2   : > { %v744_v51 = vpop.f32.mrf.mxu3 }
 0x1b3   : > { %v828_v52 = vadd.f32 %v744_v51, %v418_v48 }
 0x1b4   : > { %v796_v38 = vpop.f32.mrf.mxu0 }
 0x1b5   : > { %860 = vst [vmem:[%s1645_s20 + $0xb0] sm:$0xff] %v828_v52  ;;  %v831_v21 = vadd.f32 %v796_v38, %v470_v50 }
 0x1b7   : > { %863 = vst [vmem:[%s1645_s20 + $0xc8] sm:$0xff] %v831_v21 }
 0x1ba   : > { %v747_v58 = vpop.f32.mrf.mxu3 }
 0x1bb   : > { %v830_v61 = vadd.f32 %v747_v58, %v421_v57 }
 0x1bc   : > { %v798_v59 = vpop.f32.mrf.mxu0 }
 0x1bd   : > { %862 = vst [vmem:[%s1645_s20 + $0xc0] sm:$0xff] %v830_v61  ;;  %v833_v62 = vadd.f32 %v798_v59, %v472_v60 }
 0x1bf   : > { %865 = vst [vmem:[%s1645_s20 + $0xd8] sm:$0xff] %v833_v62 }
 0x1c2   : > { %v749_v2 = vpop.f32.mrf.mxu3 }
 0x1c3   : > { %v832_v3 = vadd.f32 %v749_v2, %v423_v0 }
 0x1c4   : > { %v801_v6 = vpop.f32.mrf.mxu0 }
 0x1c5   : > { %864 = vst [vmem:[%s1645_s20 + $0xd0] sm:$0xff] %v832_v3  ;;  %v835_v5 = vadd.f32 %v801_v6, %v475_v1 }
 0x1c7   : > { %867 = vst [vmem:[%s1645_s20 + $0xe8] sm:$0xff] %v835_v5 }
 0x1ca   : > { %v752_v9 = vpop.f32.mrf.mxu3 }
 0x1cb   : > { %v834_v32 = vadd.f32 %v752_v9, %v426_v55 }
 0x1cc   : > { %v803_v10 = vpop.f32.mrf.mxu0 }
 0x1cd   : > { %866 = vst [vmem:[%s1645_s20 + $0xe0] sm:$0xff] %v834_v32  ;;  %v837_v11 = vadd.f32 %v803_v10, %v477_v4 }
 0x1cf   : > { %869 = vst [vmem:[%s1645_s20 + $0xf8] sm:$0xff] %v837_v11 }
 0x1d2   : > { %v754_v12 = vpop.f32.mrf.mxu3 }
 0x1d3   : > { %v836_v13 = vadd.f32 %v754_v12, %v428_v16 }
 0x1d5   : > { %868 = vst [vmem:[%s1645_s20 + $0xf0] sm:$0xff] %v836_v13 }
 0x1d6   : > { %1209 = shalt.err (!%p1206_p3)
}
 0x1d7   : > { %s1246_s18 = smov 256   ;;  %s1247_s20 = smov 16  }
 0x1d8   : > { %1140 = dma.vmem_to_hbm [thread:$0]  (%p1321_p5), %s885_s10, 4096, %s887_s11, %s871_s25, %s1246_s18, %s1246_s18, %s1247_s20  }
 0x1d9 PF: > { %p1146_p4 = scmp.ge.s32.totalorder %s1244_s24, 2  ;;  %s901_s26 = sand.u32 1, %s1232_s21  }
 0x1da   : > { %s902_s28 = scalar_lea.sflag [#allocation3], %s901_s26 }
 0x1db   : > { %p1143_p7 = pnand %p1146_p4, %p1325_p6 }
 0x1dd   : > { %p1144_p8 = pneg %p1143_p7 }
 0x1df   : > { %1227 = dma.done.wait (%p1144_p8), %s902_s28, 4096  }
 0x1e0   : > { %1229 = vsyncadd (%p1144_p8), %s902_s28, 4294963200  ;;  %p16_p9 = scmp.ge.s32.totalorder %s1308_s27, 4   ;;  %s1765_s21 = smov %s1236_s22 }
 0x1e1   : > { %s1766_s22 = smov %s1240_s23  ;;  %s1767_s23 = smov %s1319_s30 }
 0x1e2   : > { %s1768_s24 = smov %s1308_s27  ;;  %18 = sbr.rel (!%p16_p9) target bundleno = 3 (0x3), region = 79 }
 0x1e7   :  { %908 = vsyncpa [#allocation3], 1 }
 0x1e8   :  { %910 = vsyncpa [#allocation3 + $0x1], 1 }

</bundles_post_ra>
